<compile_context>
chip_gen: v5e
topology: v5e:2x2
jax: 0.10.0
libtpu: 0.0.40
codegen_flags: <defaults>
</compile_context>

<pallas_src>
import jax
import jax.numpy as jnp
from jax.experimental import pallas as pl
from jax.experimental.pallas import tpu as pltpu

_LANES = 128
_SUBLANES = 8


def _round_up(x, m):
    return ((x + m - 1) // m) * m


def _vmem_capacity_bytes():
    """Physical VMEM per TensorCore; conservative 64 MiB fallback."""
    try:
        return int(pltpu.get_tpu_info().vmem_capacity_bytes)
    except Exception:
        return 64 << 20


def _spec(shape, index_map, buffers=None):
    """BlockSpec with optional explicit buffer depth (graceful fallback if the
    running JAX does not expose pipeline_mode)."""
    if buffers is not None and hasattr(pl, "Buffered"):
        try:
            return pl.BlockSpec(shape, index_map,
                                pipeline_mode=pl.Buffered(buffers))
        except TypeError:
            pass
    return pl.BlockSpec(shape, index_map)


def _occ_head_kernel(x_ref, w1_ref, b1_ref, w2_ref, b2_ref, w3_ref, b3_ref,
                     out_ref):
    # Cast the activation tile to the MXU compute dtype *inside* the kernel so
    # the wrapper never re-materializes x in HBM at a different width.
    x = x_ref[...].astype(w1_ref.dtype)
    # fc0 + ReLU  (MXU matmul, f32 accumulation; bias/ReLU stay f32)
    h = jnp.dot(x, w1_ref[...], preferred_element_type=jnp.float32)
    h = jnp.maximum(h + b1_ref[...], 0.0)
    # fc1 + ReLU
    h = jnp.dot(h.astype(w2_ref.dtype), w2_ref[...],
                preferred_element_type=jnp.float32)
    h = jnp.maximum(h + b2_ref[...], 0.0)
    # fc_occ (no activation); output columns are lane-padded to 128.
    occ = jnp.dot(h.astype(w3_ref.dtype), w3_ref[...],
                  preferred_element_type=jnp.float32) + b3_ref[...]
    out_ref[...] = occ.astype(out_ref.dtype)


def prepare_params(params, compute_dtype=jnp.bfloat16):
    """One-time preprocessing: weights -> compute dtype, biases -> f32 rows,
    fc_occ lane-padded to a multiple of 128 columns (done once, not per call)."""
    w1 = jnp.asarray(params["w1"], compute_dtype)
    w2 = jnp.asarray(params["w2"], compute_dtype)
    w3 = jnp.asarray(params["w3"], compute_dtype)
    b1 = jnp.asarray(params["b1"], jnp.float32).reshape(1, -1)
    b2 = jnp.asarray(params["b2"], jnp.float32).reshape(1, -1)
    b3 = jnp.asarray(params["b3"], jnp.float32).reshape(1, -1)
    c = w3.shape[1]
    c_pad = max(_LANES, _round_up(c, _LANES))
    if c_pad != c:
        w3 = jnp.pad(w3, ((0, 0), (0, c_pad - c)))
        b3 = jnp.pad(b3, ((0, 0), (0, c_pad - c)))
    return {"w1": w1, "b1": b1, "w2": w2, "b2": b2, "w3": w3, "b3": b3}


def binary_occ_head_forward(x_nchw, prepped, *, num_classes,
                            with_avg_pool=False, max_block_n=None):
    """BinaryOccHead forward.

    x_nchw:  [N, C, H, W] features (kept in their native dtype in HBM).
    prepped: output of prepare_params (weights [in,out], biases [1,out]).
    Returns occ_score [N, num_classes] float32.
    """
    N = x_nchw.shape[0]
    if with_avg_pool:
        # nn.AvgPool2d(roi_feat_size) == mean over the full spatial window.
        x_nchw = jnp.mean(x_nchw, axis=(2, 3), keepdims=True)
    # Flatten exactly like torch's x.view(N, -1) (row-major NCHW). No dtype
    # cast here: activations travel HBM->VMEM exactly once.
    x_flat = x_nchw.reshape(N, -1)

    w1, b1 = prepped["w1"], prepped["b1"]
    w2, b2 = prepped["w2"], prepped["b2"]
    w3, b3 = prepped["w3"], prepped["b3"]
    D0, H = w1.shape
    C_pad = w3.shape[1]
    assert x_flat.shape[1] == D0, (x_flat.shape, w1.shape)
    assert num_classes <= C_pad

    x_isz = jnp.dtype(x_flat.dtype).itemsize
    w_isz = jnp.dtype(w1.dtype).itemsize

    # --- VMEM budgeting (per TensorCore), generation-aware -------------------
    vmem_cap = _vmem_capacity_bytes()          # 128 MiB v5e/v6e, 64 MiB v7x
    vmem_budget = int(vmem_cap * 0.82)         # headroom for compiler scratch
    # Resident, single-buffered weights + biases.
    w_bytes = (D0 * H + H * H + H * C_pad) * w_isz + (2 * H + C_pad) * 4
    # Per-batch-row tile cost: up to 3 x-buffers + double-buffered f32 output.
    per_row = 3 * D0 * x_isz + 2 * C_pad * 4
    tile_budget = vmem_budget - w_bytes - (4 << 20)
    # TODO(synk): if w_bytes alone exceeds the budget (huge in_flat*fc_out on
    # v7x) the weights need a K-tiled reduction grid axis instead of being
    # resident; not implemented here.
    block_cap = max(_SUBLANES,
                    (max(tile_budget, 0) // max(per_row, 1))
                    // _SUBLANES * _SUBLANES)

    if max_block_n is None:
        # 512-1024 row tiles reach ~85% of the HBM roofline on the 128 MiB
        # chips; stay tighter on v7x's 64 MiB.
        max_block_n = 1024 if vmem_cap >= (96 << 20) else 512

    if N <= 64:
        block_n = N                      # single full-extent block
    else:
        # Always >= 2 grid steps so the "parallel" batch axis can shard across
        # both v7x TensorCores.
        target = _round_up(-(-N // 2), _SUBLANES)
        block_n = max(_SUBLANES, min(max_block_n, block_cap, target))
    n_steps = -(-N // block_n)
    # 3-deep x pipeline once there are enough steps to make it useful.
    x_buffers = 3 if n_steps >= 3 else None

    vmem_est = ((3 if x_buffers else 2) * block_n * D0 * x_isz
                + 2 * block_n * C_pad * 4
                + w_bytes)
    vmem_limit = int(min(max(vmem_est + (4 << 20), 16 << 20), vmem_budget))

    flops = 2 * N * (D0 * H + H * H + H * C_pad)
    bytes_accessed = int(N * D0 * x_isz + N * C_pad * 4 + w_bytes)

    out_pad = pl.pallas_call(
        _occ_head_kernel,
        out_shape=jax.ShapeDtypeStruct((N, C_pad), jnp.float32),
        grid_spec=pl.GridSpec(
            grid=(n_steps,),
            in_specs=[
                _spec((block_n, D0), lambda i: (i, 0), buffers=x_buffers),  # x
                _spec((D0, H), lambda i: (0, 0), buffers=1),   # w1 (resident)
                _spec((1, H), lambda i: (0, 0), buffers=1),    # b1
                _spec((H, H), lambda i: (0, 0), buffers=1),    # w2
                _spec((1, H), lambda i: (0, 0), buffers=1),    # b2
                _spec((H, C_pad), lambda i: (0, 0), buffers=1),  # w3 (padded)
                _spec((1, C_pad), lambda i: (0, 0), buffers=1),  # b3 (padded)
            ],
            out_specs=pl.BlockSpec((block_n, C_pad), lambda i: (i, 0)),
        ),
        compiler_params=pltpu.CompilerParams(
            dimension_semantics=("parallel",),   # shards batch grid on v7x 2TC
            vmem_limit_bytes=vmem_limit),
        cost_estimate=pl.CostEstimate(flops=flops, transcendentals=0,
                                      bytes_accessed=bytes_accessed),
    )(x_flat, w1, b1, w2, b2, w3, b3)

    # Slice the lane padding back to the real class count (tiny HBM pass).
    # Ragged-tail note: rows of a partial last x tile beyond N are undefined,
    # but each output row depends only on its own x row and Pallas' masked
    # boundary store discards the padding rows, so results stay exact.
    return out_pad[:, :num_classes]


def init_params(key, in_flat, fc_out_channels, num_classes, dtype=jnp.float32):
    """Xavier-uniform weights, zero biases (matches init_weights)."""
    def xavier(k, fan_in, fan_out):
        bound = (6.0 / (fan_in + fan_out)) ** 0.5
        return jax.random.uniform(k, (fan_in, fan_out), dtype,
                                  minval=-bound, maxval=bound)

    k1, k2, k3 = jax.random.split(key, 3)
    return {
        "w1": xavier(k1, in_flat, fc_out_channels),
        "b1": jnp.zeros((1, fc_out_channels), dtype),
        "w2": xavier(k2, fc_out_channels, fc_out_channels),
        "b2": jnp.zeros((1, fc_out_channels), dtype),
        "w3": xavier(k3, fc_out_channels, num_classes),
        "b3": jnp.zeros((1, num_classes), dtype),
    }


def _reference_forward(x_nchw, p, compute_dtype=jnp.bfloat16,
                       with_avg_pool=False):
    """Pure-JAX reference with the same precision recipe as the kernel."""
    if with_avg_pool:
        x_nchw = jnp.mean(x_nchw, axis=(2, 3), keepdims=True)
    x = x_nchw.reshape(x_nchw.shape[0], -1).astype(compute_dtype)
    h = jnp.dot(x, p["w1"].astype(compute_dtype),
                preferred_element_type=jnp.float32)
    h = jnp.maximum(h + p["b1"].reshape(1, -1).astype(jnp.float32), 0.0)
    h = jnp.dot(h.astype(compute_dtype), p["w2"].astype(compute_dtype),
                preferred_element_type=jnp.float32)
    h = jnp.maximum(h + p["b2"].reshape(1, -1).astype(jnp.float32), 0.0)
    return (jnp.dot(h.astype(compute_dtype), p["w3"].astype(compute_dtype),
                    preferred_element_type=jnp.float32)
            + p["b3"].reshape(1, -1).astype(jnp.float32))


if __name__ == "__main__":
    # Small shapes consistent with the module's forward:
    #   in_channels=16, roi_feat_size=4, fc_out_channels=128, num_classes=2.
    C_in, R = 16, 4
    FC_OUT, NUM_CLASSES = 128, 2

    key = jax.random.PRNGKey(0)
    kx1, kx2, kp = jax.random.split(key, 3)
    params = init_params(kp, C_in * R * R, FC_OUT, NUM_CLASSES)
    prepped = prepare_params(params)            # one-time pad + cast

    fwd = jax.jit(binary_occ_head_forward,
                  static_argnames=("num_classes", "with_avg_pool",
                                   "max_block_n"))

    # 1) Small batch: single full-extent tile.
    x_small = jax.random.normal(kx1, (8, C_in, R, R), dtype=jnp.float32)
    occ_small = fwd(x_small, prepped, num_classes=NUM_CLASSES)
    jax.block_until_ready(occ_small)
    ref_small = _reference_forward(x_small, params)
    assert occ_small.shape == (8, NUM_CLASSES), occ_small.shape
    err = float(jnp.max(jnp.abs(occ_small - ref_small)))
    assert jnp.allclose(occ_small, ref_small, atol=2e-2, rtol=2e-2), err

    # 2) Larger ragged batch with a forced small tile: exercises the multi-step
    #    grid (>= 3 steps -> 3-deep x pipeline) and the masked ragged tail.
    x_big = jax.random.normal(kx2, (203, C_in, R, R), dtype=jnp.float32)
    occ_big = fwd(x_big, prepped, num_classes=NUM_CLASSES, max_block_n=64)
    jax.block_until_ready(occ_big)
    ref_big = _reference_forward(x_big, params)
    assert occ_big.shape == (203, NUM_CLASSES), occ_big.shape
    err = float(jnp.max(jnp.abs(occ_big - ref_big)))
    assert jnp.allclose(occ_big, ref_big, atol=2e-2, rtol=2e-2), err

    print("KERNEL_OK")
</pallas_src>

<mosaic_0001>
module attributes {stable_mosaic.version = 11 : i64} {
  func.func @_occ_head_kernel(%arg0: i32, %arg1: memref<8x256xf32, #tpu.memory_space<vmem>>, %arg2: memref<256x128xbf16, #tpu.memory_space<vmem>>, %arg3: memref<1x128xf32, #tpu.memory_space<vmem>>, %arg4: memref<128x128xbf16, #tpu.memory_space<vmem>>, %arg5: memref<1x128xf32, #tpu.memory_space<vmem>>, %arg6: memref<128x128xbf16, #tpu.memory_space<vmem>>, %arg7: memref<1x128xf32, #tpu.memory_space<vmem>>, %arg8: memref<8x128xf32, #tpu.memory_space<vmem>>) attributes {dimension_semantics = [#tpu.dimension_semantics<parallel>], iteration_bounds = array<i64: 1>, scalar_prefetch = 0 : i64, scratch_operands = 0 : i64, tpu.core_type = #tpu.core_type<tc>, window_params = [{transform_indices = @transform_0, window_bounds = array<i64: 8, 256>}, {pipeline_mode = #tpu.pipeline_mode<synchronous>, transform_indices = @transform_1, window_bounds = array<i64: 256, 128>}, {pipeline_mode = #tpu.pipeline_mode<synchronous>, transform_indices = @transform_2, window_bounds = array<i64: 1, 128>}, {pipeline_mode = #tpu.pipeline_mode<synchronous>, transform_indices = @transform_3, window_bounds = array<i64: 128, 128>}, {pipeline_mode = #tpu.pipeline_mode<synchronous>, transform_indices = @transform_4, window_bounds = array<i64: 1, 128>}, {pipeline_mode = #tpu.pipeline_mode<synchronous>, transform_indices = @transform_5, window_bounds = array<i64: 128, 128>}, {pipeline_mode = #tpu.pipeline_mode<synchronous>, transform_indices = @transform_6, window_bounds = array<i64: 1, 128>}, {transform_indices = @transform_7, window_bounds = array<i64: 8, 128>}]} {
    %c0 = arith.constant 0 : index
    %c0_0 = arith.constant 0 : index
    %0 = vector.load %arg1[%c0, %c0_0] : memref<8x256xf32, #tpu.memory_space<vmem>>, vector<8x256xf32>
    %1 = arith.truncf %0 : vector<8x256xf32> to vector<8x256xbf16>
    %c0_1 = arith.constant 0 : index
    %c0_2 = arith.constant 0 : index
    %2 = vector.load %arg2[%c0_1, %c0_2] : memref<256x128xbf16, #tpu.memory_space<vmem>>, vector<256x128xbf16>
    %cst = arith.constant dense<0.000000e+00> : vector<8x128xf32>
    %3 = tpu.matmul %1, %2, %cst {dimension_numbers = #tpu.dot_dimension_numbers<[1], [0], [0], [1], [0, 0, 1, 1], [], []>} : vector<8x256xbf16>, vector<256x128xbf16>, vector<8x128xf32> -> vector<8x128xf32>
    %c0_3 = arith.constant 0 : index
    %c0_4 = arith.constant 0 : index
    %4 = vector.load %arg3[%c0_3, %c0_4] : memref<1x128xf32, #tpu.memory_space<vmem>>, vector<1x128xf32>
    %5 = vector.broadcast %4 : vector<1x128xf32> to vector<8x128xf32>
    %6 = arith.addf %3, %5 : vector<8x128xf32>
    %cst_5 = arith.constant 0.000000e+00 : f32
    %7 = vector.broadcast %cst_5 : f32 to vector<8x128xf32>
    %8 = arith.maximumf %6, %7 : vector<8x128xf32>
    %9 = arith.truncf %8 : vector<8x128xf32> to vector<8x128xbf16>
    %c0_6 = arith.constant 0 : index
    %c0_7 = arith.constant 0 : index
    %10 = vector.load %arg4[%c0_6, %c0_7] : memref<128x128xbf16, #tpu.memory_space<vmem>>, vector<128x128xbf16>
    %cst_8 = arith.constant dense<0.000000e+00> : vector<8x128xf32>
    %11 = tpu.matmul %9, %10, %cst_8 {dimension_numbers = #tpu.dot_dimension_numbers<[1], [0], [0], [1], [0, 0, 1, 1], [], []>} : vector<8x128xbf16>, vector<128x128xbf16>, vector<8x128xf32> -> vector<8x128xf32>
    %c0_9 = arith.constant 0 : index
    %c0_10 = arith.constant 0 : index
    %12 = vector.load %arg5[%c0_9, %c0_10] : memref<1x128xf32, #tpu.memory_space<vmem>>, vector<1x128xf32>
    %13 = vector.broadcast %12 : vector<1x128xf32> to vector<8x128xf32>
    %14 = arith.addf %11, %13 : vector<8x128xf32>
    %cst_11 = arith.constant 0.000000e+00 : f32
    %15 = vector.broadcast %cst_11 : f32 to vector<8x128xf32>
    %16 = arith.maximumf %14, %15 : vector<8x128xf32>
    %17 = arith.truncf %16 : vector<8x128xf32> to vector<8x128xbf16>
    %c0_12 = arith.constant 0 : index
    %c0_13 = arith.constant 0 : index
    %18 = vector.load %arg6[%c0_12, %c0_13] : memref<128x128xbf16, #tpu.memory_space<vmem>>, vector<128x128xbf16>
    %cst_14 = arith.constant dense<0.000000e+00> : vector<8x128xf32>
    %19 = tpu.matmul %17, %18, %cst_14 {dimension_numbers = #tpu.dot_dimension_numbers<[1], [0], [0], [1], [0, 0, 1, 1], [], []>} : vector<8x128xbf16>, vector<128x128xbf16>, vector<8x128xf32> -> vector<8x128xf32>
    %c0_15 = arith.constant 0 : index
    %c0_16 = arith.constant 0 : index
    %20 = vector.load %arg7[%c0_15, %c0_16] : memref<1x128xf32, #tpu.memory_space<vmem>>, vector<1x128xf32>
    %21 = vector.broadcast %20 : vector<1x128xf32> to vector<8x128xf32>
    %22 = arith.addf %19, %21 : vector<8x128xf32>
    %c0_17 = arith.constant 0 : index
    %c0_18 = arith.constant 0 : index
    %23 = vector.load %arg8[%c0_17, %c0_18] : memref<8x128xf32, #tpu.memory_space<vmem>>, vector<8x128xf32>
    tpu.vector_store %arg8[%c0_17, %c0_18], %22 {strides = array<i32>} : memref<8x128xf32, #tpu.memory_space<vmem>>, vector<8x128xf32>,
    return
  }
  func.func @transform_0(%arg0: i32) -> (i32, i32) {
    %c0_i32 = arith.constant 0 : i32
    %c0_i32_0 = arith.constant 0 : i32
    return %arg0, %c0_i32 : i32, i32
  }
  func.func @transform_1(%arg0: i32) -> (i32, i32) {
    %c0_i32 = arith.constant 0 : i32
    %c0_i32_0 = arith.constant 0 : i32
    %c0_i32_1 = arith.constant 0 : i32
    return %c0_i32, %c0_i32_0 : i32, i32
  }
  func.func @transform_2(%arg0: i32) -> (i32, i32) {
    %c0_i32 = arith.constant 0 : i32
    %c0_i32_0 = arith.constant 0 : i32
    %c0_i32_1 = arith.constant 0 : i32
    return %c0_i32, %c0_i32_0 : i32, i32
  }
  func.func @transform_3(%arg0: i32) -> (i32, i32) {
    %c0_i32 = arith.constant 0 : i32
    %c0_i32_0 = arith.constant 0 : i32
    %c0_i32_1 = arith.constant 0 : i32
    return %c0_i32, %c0_i32_0 : i32, i32
  }
  func.func @transform_4(%arg0: i32) -> (i32, i32) {
    %c0_i32 = arith.constant 0 : i32
    %c0_i32_0 = arith.constant 0 : i32
    %c0_i32_1 = arith.constant 0 : i32
    return %c0_i32, %c0_i32_0 : i32, i32
  }
  func.func @transform_5(%arg0: i32) -> (i32, i32) {
    %c0_i32 = arith.constant 0 : i32
    %c0_i32_0 = arith.constant 0 : i32
    %c0_i32_1 = arith.constant 0 : i32
    return %c0_i32, %c0_i32_0 : i32, i32
  }
  func.func @transform_6(%arg0: i32) -> (i32, i32) {
    %c0_i32 = arith.constant 0 : i32
    %c0_i32_0 = arith.constant 0 : i32
    %c0_i32_1 = arith.constant 0 : i32
    return %c0_i32, %c0_i32_0 : i32, i32
  }
  func.func @transform_7(%arg0: i32) -> (i32, i32) {
    %c0_i32 = arith.constant 0 : i32
    %c0_i32_0 = arith.constant 0 : i32
    return %arg0, %c0_i32 : i32, i32
  }
}

</mosaic_0001>

<bundles_post_ra>
// kernel: binary_occ_head_forward.1
= control target key start
LH: loop header
LB: loop body
LE: loop exit
PB: predicated region body
PF: predicated region fallthrough
CT: control target
= control target key end

     0   :  { %s676_s1 = inlined_call_operand.vmem [shape: bf16[256,128], index: 1, kind: input, shape index: {}]   ;;  %s677_s3 = inlined_call_operand.vmem [shape: bf16[128,128], index: 3, kind: input, shape index: {}]   ;;  %s678_s2 = inlined_call_operand.vmem [shape: f32[1,128], index: 2, kind: input, shape index: {}]   ;;  %s679_s0 = inlined_call_operand.vmem [shape: f32[8,256], index: 0, kind: input, shape index: {}]   ;;  %s680_s4 = inlined_call_operand.vmem [shape: f32[1,128], index: 4, kind: input, shape index: {}]   ;;  %s681_s5 = inlined_call_operand.vmem [shape: bf16[128,128], index: 5, kind: input, shape index: {}]   ;;  %s682_s6 = inlined_call_operand.vmem [shape: f32[1,128], index: 6, kind: input, shape index: {}]   ;;  %s683_s7 = inlined_call_operand.vmem [shape: f32[8,128], index: 7, kind: output, shape index: {}]  }
   0x1   :  { %v494_v0 = vld [vmem:[%s676_s1 + $0x38] sm:$0xff]  ;;  %v493_v2 = vld [vmem:[%s676_s1 + $0x30] sm:$0xff]  ;;  %v492_v4 = vld [vmem:[%s676_s1 + $0x28] sm:$0xff] }
   0x2   :  { %v502_v1 = vld [vmem:[%s676_s1 + $0x78] sm:$0xff]  ;;  %162 = vmatpush.bf16.msra.mxu0 %v494_v0  ;;  %v501_v3 = vld [vmem:[%s676_s1 + $0x70] sm:$0xff]  ;;  %v500_v5 = vld [vmem:[%s676_s1 + $0x68] sm:$0xff] }
   0x3   :  { %175 = vmatpush.bf16.msra.mxu1 %v502_v1  ;;  %v510_v6 = vld [vmem:[%s677_s3 + $0x38] sm:$0xff]  ;;  %v509_v7 = vld [vmem:[%s677_s3 + $0x30] sm:$0xff]  ;;  %v491_v8 = vld [vmem:[%s676_s1 + $0x20] sm:$0xff] }
   0x4   :  { %258 = vmatpush.bf16.msra.mxu2 %v510_v6  ;;  %v499_v9 = vld [vmem:[%s676_s1 + $0x60] sm:$0xff]  ;;  %v508_v10 = vld [vmem:[%s677_s3 + $0x28] sm:$0xff]  ;;  %v490_v11 = vld [vmem:[%s676_s1 + $0x18] sm:$0xff] }
   0x5   :  { %v498_v12 = vld [vmem:[%s676_s1 + $0x58] sm:$0xff]  ;;  %v507_v13 = vld [vmem:[%s677_s3 + $0x20] sm:$0xff]  ;;  %v489_v14 = vld [vmem:[%s676_s1 + $0x10] sm:$0xff] }
   0x6   :  { %163 = vmatpush.bf16.msra.mxu0 %v493_v2  ;;  %v497_v15 = vld [vmem:[%s676_s1 + $0x50] sm:$0xff]  ;;  %v506_v16 = vld [vmem:[%s677_s3 + $0x18] sm:$0xff]  ;;  %v488_v17 = vld [vmem:[%s676_s1 + $0x8] sm:$0xff] }
   0x7   :  { %176 = vmatpush.bf16.msra.mxu1 %v501_v3  ;;  %v496_v18 = vld [vmem:[%s676_s1 + $0x48] sm:$0xff]  ;;  %v505_v19 = vld [vmem:[%s677_s3 + $0x10] sm:$0xff]  ;;  %v487_v20 = vld [vmem:[%s676_s1] sm:$0xff] }
   0x8   :  { %259 = vmatpush.bf16.msra.mxu2 %v509_v7  ;;  %v495_v21 = vld [vmem:[%s676_s1 + $0x40] sm:$0xff]  ;;  %v27_v23 = vld [vmem:[%s679_s0 + $0x8] sm:$0xff]  ;;  %v518_v28 = vld [vmem:[%s681_s5 + $0x38] sm:$0xff] }
   0x9   :  { %v26_v22 = vld [vmem:[%s679_s0] sm:$0xff]  ;;  %v29_v25 = vpack.c.bf16 %v27_v23, %v27_v23  ;;  %v504_v26 = vld [vmem:[%s677_s3 + $0x8] sm:$0xff]  ;;  %341 = vmatpush.bf16.msra.mxu3 %v518_v28  ;;  %v517_v29 = vld [vmem:[%s681_s5 + $0x30] sm:$0xff] }
   0xa   :  { %164 = vmatpush.bf16.msra.mxu0 %v492_v4  ;;  %v28_v24 = vpack.c.bf16 %v26_v22, %v26_v22  ;;  %v503_v27 = vld [vmem:[%s677_s3] sm:$0xff]  ;;  %v516_v30 = vld [vmem:[%s681_s5 + $0x28] sm:$0xff]  ;;  %v514_v32 = vld [vmem:[%s681_s5 + $0x18] sm:$0xff] }
   0xb   :  { %177 = vmatpush.bf16.msra.mxu1 %v500_v5  ;;  %v515_v31 = vld [vmem:[%s681_s5 + $0x20] sm:$0xff]  ;;  %v513_v33 = vld [vmem:[%s681_s5 + $0x10] sm:$0xff]  ;;  %v512_v43 = vld [vmem:[%s681_s5 + $0x8] sm:$0xff] }
   0xc   :  { %260 = vmatpush.bf16.msra.mxu2 %v508_v10  ;;  %v519_v34 = vld [vmem:[%s678_s2] ss:$0 sm:$0xff] }
   0xd   :  { %342 = vmatpush.bf16.msra.mxu3 %v517_v29  ;;  %v511_v44 = vld [vmem:[%s681_s5] sm:$0xff] }
   0xe   :  { %165 = vmatpush.bf16.msra.mxu0 %v491_v8  ;;  %v520_v45 = vld [vmem:[%s680_s4] ss:$0 sm:$0xff] }
   0xf   :  { %178 = vmatpush.bf16.msra.mxu1 %v499_v9  ;;  %v521_v51 = vld [vmem:[%s682_s6] ss:$0 sm:$0xff] }
  0x10   :  { %261 = vmatpush.bf16.msra.mxu2 %v507_v13 }
  0x11   :  { %343 = vmatpush.bf16.msra.mxu3 %v516_v30 }
  0x12   :  { %166 = vmatpush.bf16.msra.mxu0 %v490_v11 }
  0x13   :  { %179 = vmatpush.bf16.msra.mxu1 %v498_v12 }
  0x14   :  { %262 = vmatpush.bf16.msra.mxu2 %v506_v16 }
  0x15   :  { %344 = vmatpush.bf16.msra.mxu3 %v515_v31 }
  0x16   :  { %167 = vmatpush.bf16.msra.mxu0 %v489_v14 }
  0x17   :  { %180 = vmatpush.bf16.msra.mxu1 %v497_v15 }
  0x18   :  { %263 = vmatpush.bf16.msra.mxu2 %v505_v19 }
  0x19   :  { %345 = vmatpush.bf16.msra.mxu3 %v514_v32 }
  0x1a   :  { %168 = vmatpush.bf16.msra.mxu0 %v488_v17 }
  0x1b   :  { %181 = vmatpush.bf16.msra.mxu1 %v496_v18 }
  0x1c   :  { %264 = vmatpush.bf16.msra.mxu2 %v504_v26 }
  0x1d   :  { %346 = vmatpush.bf16.msra.mxu3 %v513_v33 }
  0x1e   :  { %169 = vmatpush.bf16.msra.mxu0 %v487_v20 }
  0x1f   :  { %182 = vmatpush.bf16.msra.mxu1 %v495_v21 }
  0x20   :  { %265 = vmatpush.bf16.msra.mxu2 %v503_v27 }
  0x21   :  { %170 = vmatmul.bf16.vlgmr.msra.gmra.mxu0 %v28_v24  ;;  %347 = vmatpush.bf16.msra.mxu3 %v512_v43 }
  0x22   :  { %183 = vmatmul.bf16.vlgmr.msra.gmra.mxu1 %v29_v25 }
  0x25   :  { %348 = vmatpush.bf16.msra.mxu3 %v511_v44 }
  0x9e   :  { %v171_v35 = vpop.f32.mrf.mxu0 }
  0x9f   :  { %v184_v36 = vpop.f32.mrf.mxu1  ;;  %v172_v37 = vadd.f32 %v519_v34, %v171_v35 }
  0xa1   :  { %v185_v38 = vadd.f32 %v184_v36, %v172_v37 }
  0xa3   :  { %v188_v39 = vmax.f32 %v185_v38, 0.0 }
  0xa5   :  { %v189_v40 = vpack.c.bf16 %v188_v39, %v188_v39 }
  0xa6   :  { %v173_v41 = vpop.f32.mrf.mxu0 }
  0xa7   :  { %v186_v42 = vpop.f32.mrf.mxu1  ;;  %266 = vmatmul.bf16.vlgmr.msra.gmra.mxu2 %v189_v40 }
 0x12a   :  { %v267_v46 = vpop.f32.mrf.mxu2 }
 0x12b   :  { %v268_v47 = vadd.f32 %v520_v45, %v267_v46 }
 0x12d   :  { %v271_v48 = vmax.f32 %v268_v47, 0.0 }
 0x12f   :  { %v272_v49 = vpack.c.bf16 %v271_v48, %v271_v48 }
 0x131   :  { %349 = vmatmul.bf16.vlgmr.msra.gmra.mxu3 %v272_v49 }
 0x132   :  { %v269_v50 = vpop.f32.mrf.mxu2 }
 0x1b4   :  { %v350_v52 = vpop.f32.mrf.mxu3 }
 0x1b5   :  { %v351_v53 = vadd.f32 %v521_v51, %v350_v52 }
 0x1b7   :  { %354 = vst [vmem:[%s683_s7] sm:$0xff] %v351_v53 }
 0x1bc   :  { %v352_v54 = vpop.f32.mrf.mxu3 }

</bundles_post_ra>
